<compile_context>
chip_gen: v6e
topology: v6e:2x2x1
jax: 0.10.0
libtpu: 0.0.40
codegen_flags: <defaults>
</compile_context>

<pallas_src>
import jax
import jax.numpy as jnp
from jax.experimental import pallas as pl
from jax.experimental.pallas import tpu as pltpu

TILE_LIN = 512    # N tile for the point-wise Linear+BN+ReLU kernel
TILE_SEG = 512    # N tile for the segment-mean kernel
TILE_MAX = 128    # N tile for the fused Linear+BN+ReLU+segment-max kernel
P_TILE_CAP = 128  # max pillar tile (keeps per-block masked-max temp <= 2 MiB)
VMEM_LIMIT = 48 * 1024 * 1024  # explicit budget, safe for v7x's 64 MiB VMEM

assert TILE_LIN % TILE_MAX == 0 and TILE_LIN % TILE_SEG == 0


def _round_up(x, m):
    return ((x + m - 1) // m) * m


# -----------------------------------------------------------------------------
# Kernel A: fused Linear (no bias) + BatchNorm1d (folded scale/shift) + ReLU
# -----------------------------------------------------------------------------
def _linear_bn_relu_kernel(x_ref, w_ref, scale_ref, shift_ref, o_ref):
    y = jnp.dot(x_ref[...], w_ref[...], preferred_element_type=jnp.float32)
    o_ref[...] = jnp.maximum(y * scale_ref[...] + shift_ref[...], 0.0)


def linear_bn_relu(x, w, scale, shift, tile_n):
    """x: (N_pad, Cin) f32 (N_pad % tile_n == 0), w: (Cin, Cout), scale/shift: (1, Cout)."""
    n_pad, cin = x.shape
    cout = w.shape[1]
    return pl.pallas_call(
        _linear_bn_relu_kernel,
        out_shape=jax.ShapeDtypeStruct((n_pad, cout), jnp.float32),
        grid=(n_pad // tile_n,),
        in_specs=[
            pl.BlockSpec((tile_n, cin), lambda i: (i, 0)),
            pl.BlockSpec((cin, cout), lambda i: (0, 0)),
            pl.BlockSpec((1, cout), lambda i: (0, 0)),
            pl.BlockSpec((1, cout), lambda i: (0, 0)),
        ],
        out_specs=pl.BlockSpec((tile_n, cout), lambda i: (i, 0)),
        compiler_params=pltpu.CompilerParams(
            dimension_semantics=("parallel",),
            vmem_limit_bytes=VMEM_LIMIT),
    )(x, w, scale, shift)


# -----------------------------------------------------------------------------
# Kernel B: segment mean (torch_scatter.scatter_mean), tiled over (P, N)
# -----------------------------------------------------------------------------
def _segment_mean_kernel(seg_ref, x_ref, o_ref, sum_ref, cnt_ref):
    n_idx = pl.program_id(1)

    @pl.when(n_idx == 0)
    def _():
        sum_ref[...] = jnp.zeros_like(sum_ref)
        cnt_ref[...] = jnp.zeros_like(cnt_ref)

    p_tile = o_ref.shape[0]
    tile_n = x_ref.shape[0]
    base = pl.program_id(0) * p_tile
    pillar_ids = jax.lax.broadcasted_iota(jnp.int32, (p_tile, tile_n), 0) + base
    match = seg_ref[...] == pillar_ids                       # (P_TILE, TILE_N)
    # One-hot is exact in bf16; x in bf16 costs ~1e-3 relative error on the mean
    # but runs the MXU at full bf16 rate (per perf review).  Accumulate in f32.
    onehot = match.astype(jnp.bfloat16)
    sum_ref[...] += jnp.dot(onehot, x_ref[...].astype(jnp.bfloat16),
                            preferred_element_type=jnp.float32)
    cnt_ref[...] += jnp.sum(match.astype(jnp.float32), axis=1, keepdims=True)

    @pl.when(n_idx == pl.num_programs(1) - 1)
    def _():
        inv = pl.reciprocal(jnp.maximum(cnt_ref[...], 1.0), approx=True)
        o_ref[...] = sum_ref[...] * inv


def segment_mean(x, seg2d, p_pad, p_tile, tile_n):
    """x: (N_pad, C), seg2d: (1, N_pad) int32 (padded rows = -1) -> (p_pad, C)."""
    n_pad, c = x.shape
    grid = (p_pad // p_tile, n_pad // tile_n)
    return pl.pallas_call(
        _segment_mean_kernel,
        out_shape=jax.ShapeDtypeStruct((p_pad, c), jnp.float32),
        grid=grid,
        in_specs=[
            pl.BlockSpec((1, tile_n), lambda p, n: (0, n)),
            pl.BlockSpec((tile_n, c), lambda p, n: (n, 0)),
        ],
        out_specs=pl.BlockSpec((p_tile, c), lambda p, n: (p, 0)),
        scratch_shapes=[pltpu.VMEM((p_tile, c), jnp.float32),
                        pltpu.VMEM((p_tile, 1), jnp.float32)],
        compiler_params=pltpu.CompilerParams(
            dimension_semantics=("parallel", "arbitrary"),
            vmem_limit_bytes=VMEM_LIMIT),
    )(seg2d, x)


# -----------------------------------------------------------------------------
# Kernel C: fused Linear (W1_h split) + BN + ReLU + segment max, tiled over (P, N)
# -----------------------------------------------------------------------------
def _linear_bn_relu_segmax_kernel(seg_ref, h_ref, mg_ref, w_ref, scale_ref,
                                  shift_ref, feat_ref, pool_ref):
    n_idx = pl.program_id(1)

    @pl.when(n_idx == 0)
    def _():
        # Activations are post-ReLU (>= 0), so a 0-init is equivalent to
        # -inf init + clamp-to-0 for empty pillars (matches previous semantics).
        pool_ref[...] = jnp.zeros_like(pool_ref)

    # per-point activation for this N tile: relu((h @ W1_h + (x_mean @ W1_m)[inv]) * s + b)
    y = jnp.dot(h_ref[...], w_ref[...], preferred_element_type=jnp.float32) + mg_ref[...]
    act = jnp.maximum(y * scale_ref[...] + shift_ref[...], 0.0)    # (TILE_N, C)
    feat_ref[...] = act

    p_tile = pool_ref.shape[0]
    tile_n, _ = act.shape
    base = pl.program_id(0) * p_tile
    pillar_ids = jax.lax.broadcasted_iota(jnp.int32, (p_tile, tile_n), 0) + base
    mask = seg_ref[...] == pillar_ids                              # (P_TILE, TILE_N)
    # Bounded per-block masked max: (P_TILE, TILE_N, C) <= 2 MiB (vs full P*N*C before).
    masked = jnp.where(mask[:, :, None], act[None, :, :], 0.0)
    pool_ref[...] = jnp.maximum(pool_ref[...], jnp.max(masked, axis=1))


def linear_bn_relu_segmax(seg2d, h, mg, w1h, scale, shift, p_pad, p_tile, tile_n):
    """Returns (dsp_feat (N_pad, C), pooled (p_pad, C))."""
    n_pad, c = h.shape
    grid = (p_pad // p_tile, n_pad // tile_n)
    # NOTE: the P axis is "arbitrary" here (not "parallel") because the dsp_feat
    # blocks are rewritten (identically) for every P tile; for the common case
    # p_tiles == 1 there is no redundancy.  segment_mean keeps the "parallel" P axis.
    return pl.pallas_call(
        _linear_bn_relu_segmax_kernel,
        out_shape=(jax.ShapeDtypeStruct((n_pad, c), jnp.float32),
                   jax.ShapeDtypeStruct((p_pad, c), jnp.float32)),
        grid=grid,
        in_specs=[
            pl.BlockSpec((1, tile_n), lambda p, n: (0, n)),
            pl.BlockSpec((tile_n, c), lambda p, n: (n, 0)),
            pl.BlockSpec((tile_n, c), lambda p, n: (n, 0)),
            pl.BlockSpec((c, c), lambda p, n: (0, 0)),
            pl.BlockSpec((1, c), lambda p, n: (0, 0)),
            pl.BlockSpec((1, c), lambda p, n: (0, 0)),
        ],
        out_specs=(pl.BlockSpec((tile_n, c), lambda p, n: (n, 0)),
                   pl.BlockSpec((p_tile, c), lambda p, n: (p, 0))),
        compiler_params=pltpu.CompilerParams(
            dimension_semantics=("arbitrary", "arbitrary"),
            vmem_limit_bytes=VMEM_LIMIT),
    )(seg2d, h, mg, w1h, scale, shift)


# -----------------------------------------------------------------------------
# Parameters (deterministic synthetic init; shapes follow DSP.__init__ with
# parallel=['standard'], num_point_features=13, voxel_channel=32)
# -----------------------------------------------------------------------------
def init_params(key, num_point_features=13, voxel_channel=32):
    k0, k1, k2, k3, k4, k5 = jax.random.split(key, 6)

    def bn_fold(kg, kb, c, eps=1e-3):
        gamma = 1.0 + 0.1 * jax.random.normal(kg, (c,), jnp.float32)
        beta = 0.1 * jax.random.normal(kb, (c,), jnp.float32)
        running_mean = jnp.zeros((c,), jnp.float32)
        running_var = jnp.ones((c,), jnp.float32)
        scale = gamma / jnp.sqrt(running_var + eps)
        shift = beta - running_mean * scale
        return scale.reshape(1, c), shift.reshape(1, c)

    # blocks[0]: Linear(num_point_features, voxel_channel, bias=False)
    w0 = (jax.random.normal(k0, (voxel_channel, num_point_features), jnp.float32)
          / jnp.sqrt(jnp.float32(num_point_features)))
    # blocks[1] (= blocks[-1]): Linear(voxel_channel*2, voxel_channel, bias=False)
    w1 = (jax.random.normal(k1, (voxel_channel, 2 * voxel_channel), jnp.float32)
          / jnp.sqrt(jnp.float32(2 * voxel_channel)))
    s0, b0 = bn_fold(k2, k3, voxel_channel)
    s1, b1 = bn_fold(k4, k5, voxel_channel)
    return dict(w0=w0, w1=w1, s0=s0, b0=b0, s1=s1, b1=b1)


# -----------------------------------------------------------------------------
# DSP.forward (parallel=['standard'] path)
# -----------------------------------------------------------------------------
def dsp_forward(params, batch_dict, f_center, unq_inv, f_cluster, f_relative,
                point_cloud_range, voxel_size, num_pillars):
    # NOTE: num_pillars is data-dependent (torch.unique); this pipeline needs a
    # static max-pillar count + padding to run under jit.
    points = batch_dict['points']

    # forward() computes this unconditionally; unused on the 'standard' path.
    _points_coords_3d = jnp.floor(
        (points[:, 1:4] - point_cloud_range[0:3]) / voxel_size).astype(jnp.int32)
    del _points_coords_3d

    n = points.shape[0]
    cv = params['w0'].shape[0]                    # voxel_channel
    n_pad = _round_up(n, TILE_LIN)

    p = int(num_pillars)
    p_tile = min(P_TILE_CAP, _round_up(p, 8))
    p_pad = _round_up(p, p_tile)

    # Segment ids, padded with -1 so padded rows never match any pillar.
    seg = unq_inv.astype(jnp.int32)
    seg_pad = jnp.concatenate(
        [seg, jnp.full((n_pad - n,), -1, jnp.int32)], axis=0)
    seg2d = seg_pad.reshape(1, n_pad)

    # --- standard branch: gen_feat with blocks[0] --------------------------
    # Build the K-padded (13 -> 16) feature tensor directly in the concat.
    k_raw = f_center.shape[1] + (points.shape[1] - 1) + f_cluster.shape[1] + f_relative.shape[1]
    k_pad = _round_up(k_raw, 8)
    parts = [f_center, points[:, 1:], f_cluster, f_relative]
    if k_pad > k_raw:
        parts.append(jnp.zeros((n, k_pad - k_raw), jnp.float32))
    feat_in = jnp.concatenate(parts, axis=-1)                        # (N, 16)
    feat_in = jnp.pad(feat_in, ((0, n_pad - n), (0, 0)))             # (N_pad, 16)
    w0 = jnp.pad(params['w0'].T, ((0, k_pad - k_raw), (0, 0)))       # (16, Cv)

    # TODO(synk): BatchNorm1d is applied in eval mode (running stats folded into
    # scale/shift); training-mode batch statistics are not computed in-kernel.
    h = linear_bn_relu(feat_in, w0, params['s0'], params['b0'], TILE_LIN)  # (N_pad, Cv)

    x_mean_pad = segment_mean(h, seg2d, p_pad, p_tile, TILE_SEG)     # (P_pad, Cv)
    x_mean = x_mean_pad[:p]
    batch_dict = dict(batch_dict)
    batch_dict['x_mean'] = x_mean

    # --- blocks[-1] + scatter_max pooling (fused, W1 split) ----------------
    # out = relu((h @ W1_h + (x_mean @ W1_m)[unq_inv]) * s1 + b1)
    w1t = params['w1'].T                                             # (2Cv, Cv)
    w1h, w1m = w1t[:cv], w1t[cv:]
    m_proj = jnp.dot(x_mean_pad, w1m)                                # (P_pad, Cv), tiny
    gather_idx = jnp.maximum(seg_pad, 0)                             # clamp padded rows
    mg = m_proj[gather_idx]                                          # (N_pad, Cv)

    feat_pad, pooled_pad = linear_bn_relu_segmax(
        seg2d, h, mg, w1h, params['s1'], params['b1'], p_pad, p_tile, TILE_MAX)

    batch_dict['dsp_feat'] = feat_pad[:n]
    # TODO(synk): torch_scatter.scatter_max also returns argmax indices and uses a
    # different empty-segment fill; outputs here are post-ReLU so 0-fill is equivalent.
    pooled = pooled_pad[:p]
    return pooled, batch_dict


# -----------------------------------------------------------------------------
if __name__ == "__main__":
    key = jax.random.PRNGKey(0)
    kp, kw = jax.random.split(key)

    # Small deterministic point cloud (what the DynamicPillarVFE caller provides)
    batch_size = 2
    n_per_batch = 128
    N = batch_size * n_per_batch
    point_cloud_range = jnp.array([0., 0., -1., 8., 8., 3.], jnp.float32)
    voxel_size = jnp.array([1., 1., 4.], jnp.float32)
    grid_size = jnp.array([8, 8, 1], jnp.int32)
    voxel_x, voxel_y = 1.0, 1.0
    x_offset = voxel_x / 2 + float(point_cloud_range[0])
    y_offset = voxel_y / 2 + float(point_cloud_range[1])
    z_offset = float(voxel_size[2]) / 2 + float(point_cloud_range[2])

    kxyz, kint = jax.random.split(kp)
    xyz = jax.random.uniform(
        kxyz, (N, 3), jnp.float32,
        minval=jnp.array([0., 0., -1.], jnp.float32),
        maxval=jnp.array([8., 8., 3.], jnp.float32))
    intensity = jax.random.uniform(kint, (N, 1), jnp.float32)
    b_idx = jnp.repeat(jnp.arange(batch_size, dtype=jnp.float32), n_per_batch)[:, None]
    points = jnp.concatenate([b_idx, xyz, intensity], axis=1)        # (N, 5)

    # Pillar assignment (caller-side)
    coords = jnp.floor((xyz[:, :2] - point_cloud_range[:2]) / voxel_size[:2]).astype(jnp.int32)
    coords = jnp.clip(coords, 0, grid_size[:2] - 1)
    merge = (b_idx[:, 0].astype(jnp.int32) * int(grid_size[0] * grid_size[1])
             + coords[:, 0] * int(grid_size[1]) + coords[:, 1])
    unq, unq_inv = jnp.unique(merge, return_inverse=True)
    unq_inv = unq_inv.astype(jnp.int32)
    P = int(unq.shape[0])

    f_center = jnp.stack([
        xyz[:, 0] - (coords[:, 0].astype(jnp.float32) * voxel_x + x_offset),
        xyz[:, 1] - (coords[:, 1].astype(jnp.float32) * voxel_y + y_offset),
        xyz[:, 2] - z_offset,
    ], axis=1)

    seg_sum = jax.ops.segment_sum(xyz, unq_inv, num_segments=P)
    seg_cnt = jax.ops.segment_sum(jnp.ones((N, 1), jnp.float32), unq_inv, num_segments=P)
    points_mean = seg_sum / jnp.maximum(seg_cnt, 1.0)
    f_cluster = xyz - points_mean[unq_inv]
    f_relative = xyz - point_cloud_range[:3]

    params = init_params(kw, num_point_features=13, voxel_channel=32)
    batch_dict = {'points': points}

    pooled, batch_dict = dsp_forward(params, batch_dict, f_center, unq_inv,
                                     f_cluster, f_relative,
                                     point_cloud_range, voxel_size, P)
    jax.block_until_ready(pooled)
    assert pooled.shape == (P, 32)
    assert batch_dict['dsp_feat'].shape == (N, 32)
    assert batch_dict['x_mean'].shape == (P, 32)
    print("KERNEL_OK")
</pallas_src>

<mosaic_0001>
module attributes {stable_mosaic.version = 11 : i64} {
  func.func @_linear_bn_relu_kernel(%arg0: i32, %arg1: memref<512x16xf32, #tpu.memory_space<vmem>>, %arg2: memref<16x32xf32, #tpu.memory_space<vmem>>, %arg3: memref<1x32xf32, #tpu.memory_space<vmem>>, %arg4: memref<1x32xf32, #tpu.memory_space<vmem>>, %arg5: memref<512x32xf32, #tpu.memory_space<vmem>>) attributes {dimension_semantics = [#tpu.dimension_semantics<parallel>], iteration_bounds = array<i64: 1>, scalar_prefetch = 0 : i64, scratch_operands = 0 : i64, tpu.core_type = #tpu.core_type<tc>, window_params = [{transform_indices = @transform_0, window_bounds = array<i64: 512, 16>}, {pipeline_mode = #tpu.pipeline_mode<synchronous>, transform_indices = @transform_1, window_bounds = array<i64: 16, 32>}, {pipeline_mode = #tpu.pipeline_mode<synchronous>, transform_indices = @transform_2, window_bounds = array<i64: 1, 32>}, {pipeline_mode = #tpu.pipeline_mode<synchronous>, transform_indices = @transform_3, window_bounds = array<i64: 1, 32>}, {transform_indices = @transform_4, window_bounds = array<i64: 512, 32>}]} {
    %c0 = arith.constant 0 : index
    %c0_0 = arith.constant 0 : index
    %0 = vector.load %arg1[%c0, %c0_0] : memref<512x16xf32, #tpu.memory_space<vmem>>, vector<512x16xf32>
    %c0_1 = arith.constant 0 : index
    %c0_2 = arith.constant 0 : index
    %1 = vector.load %arg2[%c0_1, %c0_2] : memref<16x32xf32, #tpu.memory_space<vmem>>, vector<16x32xf32>
    %cst = arith.constant dense<0.000000e+00> : vector<512x32xf32>
    %2 = tpu.matmul %0, %1, %cst {dimension_numbers = #tpu.dot_dimension_numbers<[1], [0], [0], [1], [0, 0, 1, 1], [], []>} : vector<512x16xf32>, vector<16x32xf32>, vector<512x32xf32> -> vector<512x32xf32>
    %c0_3 = arith.constant 0 : index
    %c0_4 = arith.constant 0 : index
    %3 = vector.load %arg3[%c0_3, %c0_4] : memref<1x32xf32, #tpu.memory_space<vmem>>, vector<1x32xf32>
    %4 = vector.broadcast %3 : vector<1x32xf32> to vector<512x32xf32>
    %5 = arith.mulf %2, %4 : vector<512x32xf32>
    %c0_5 = arith.constant 0 : index
    %c0_6 = arith.constant 0 : index
    %6 = vector.load %arg4[%c0_5, %c0_6] : memref<1x32xf32, #tpu.memory_space<vmem>>, vector<1x32xf32>
    %7 = vector.broadcast %6 : vector<1x32xf32> to vector<512x32xf32>
    %8 = arith.addf %5, %7 : vector<512x32xf32>
    %cst_7 = arith.constant 0.000000e+00 : f32
    %9 = vector.broadcast %cst_7 : f32 to vector<512x32xf32>
    %10 = arith.maximumf %8, %9 : vector<512x32xf32>
    %c0_8 = arith.constant 0 : index
    %c0_9 = arith.constant 0 : index
    %11 = vector.load %arg5[%c0_8, %c0_9] : memref<512x32xf32, #tpu.memory_space<vmem>>, vector<512x32xf32>
    tpu.vector_store %arg5[%c0_8, %c0_9], %10 {strides = array<i32>} : memref<512x32xf32, #tpu.memory_space<vmem>>, vector<512x32xf32>,
    return
  }
  func.func @transform_0(%arg0: i32) -> (i32, i32) {
    %c0_i32 = arith.constant 0 : i32
    %c0_i32_0 = arith.constant 0 : i32
    return %arg0, %c0_i32 : i32, i32
  }
  func.func @transform_1(%arg0: i32) -> (i32, i32) {
    %c0_i32 = arith.constant 0 : i32
    %c0_i32_0 = arith.constant 0 : i32
    %c0_i32_1 = arith.constant 0 : i32
    return %c0_i32, %c0_i32_0 : i32, i32
  }
  func.func @transform_2(%arg0: i32) -> (i32, i32) {
    %c0_i32 = arith.constant 0 : i32
    %c0_i32_0 = arith.constant 0 : i32
    %c0_i32_1 = arith.constant 0 : i32
    return %c0_i32, %c0_i32_0 : i32, i32
  }
  func.func @transform_3(%arg0: i32) -> (i32, i32) {
    %c0_i32 = arith.constant 0 : i32
    %c0_i32_0 = arith.constant 0 : i32
    %c0_i32_1 = arith.constant 0 : i32
    return %c0_i32, %c0_i32_0 : i32, i32
  }
  func.func @transform_4(%arg0: i32) -> (i32, i32) {
    %c0_i32 = arith.constant 0 : i32
    %c0_i32_0 = arith.constant 0 : i32
    return %arg0, %c0_i32 : i32, i32
  }
}

</mosaic_0001>

<bundles_post_ra>
// kernel: tpu_custom_call.1
= control target key start
LH: loop header
LB: loop body
LE: loop exit
PB: predicated region body
PF: predicated region fallthrough
CT: control target
= control target key end

     0   :  { %vm83_vm0 = vcmask 130048   ;;  %vm867_vm1 = vcmask 261120   ;;  %s1853_s1 = inlined_call_operand.vmem [shape: f32[16,32], index: 1, kind: input, shape index: {}]   ;;  %s1854_s0 = inlined_call_operand.vmem [shape: f32[512,16], index: 0, kind: input, shape index: {}]   ;;  %s1855_s2 = inlined_call_operand.vmem [shape: f32[1,32], index: 2, kind: input, shape index: {}]   ;;  %s1856_s3 = inlined_call_operand.vmem [shape: f32[1,32], index: 3, kind: input, shape index: {}]   ;;  %s1857_s4 = inlined_call_operand.vmem [shape: f32[512,32], index: 4, kind: output, shape index: {}]  }
   0x1   :  { %v82_v0 = vld [vmem:[%s1853_s1 + $0x8] sm:$0xff]  ;;  %v81_v1 = vld [vmem:[%s1853_s1] sm:$0xff]  ;;  %v19_v6 = vld [vmem:[%s1854_s0 + $0x10] sm:$0xff] }
   0x2   :  { %1068 = vmatprep.subr.mxu0 %v82_v0  ;;  %1168 = vmatprep.subr.mxu1 %v82_v0  ;;  %v17_v2 = vld [vmem:[%s1854_s0] sm:$0xff]  ;;  %v18_v4 = vld [vmem:[%s1854_s0 + $0x8] sm:$0xff]  ;;  %v51_v7 = vld [vmem:[%s1854_s0 + $0x110] sm:$0xff] }
   0x3   :  { %1069 = vmatpush3.msra.mxu0 %v82_v0  ;;  %1170 = vmatpush3.msra.mxu1 %v82_v0  ;;  %v49_v3 = vld [vmem:[%s1854_s0 + $0x100] sm:$0xff]  ;;  %v50_v5 = vld [vmem:[%s1854_s0 + $0x108] sm:$0xff]  ;;  %v20_v8 = vld [vmem:[%s1854_s0 + $0x18] sm:$0xff] }
   0x4   :  { %1070 = vmatprep.subr.mxu0 %v81_v1  ;;  %1169 = vmatprep.subr.mxu1 %v81_v1  ;;  %v52_v9 = vld [vmem:[%s1854_s0 + $0x118] sm:$0xff]  ;;  %v21_v10 = vld [vmem:[%s1854_s0 + $0x20] sm:$0xff]  ;;  %v22_v12 = vld [vmem:[%s1854_s0 + $0x28] sm:$0xff] }
   0x5   :  { %1071 = vmatpush3.msra.mxu0 %v81_v1  ;;  %1171 = vmatpush3.msra.mxu1 %v81_v1  ;;  %v53_v11 = vld [vmem:[%s1854_s0 + $0x120] sm:$0xff]  ;;  %v54_v13 = vld [vmem:[%s1854_s0 + $0x128] sm:$0xff]  ;;  %v23_v14 = vld [vmem:[%s1854_s0 + $0x30] sm:$0xff] }
   0x6   :  { %1072 = vmatprep.mubr.msk.f32.mxu0 %vm83_vm0, %v17_v2  ;;  %1120 = vmatprep.mubr.msk.f32.mxu1 %vm83_vm0, %v49_v3  ;;  %v55_v15 = vld [vmem:[%s1854_s0 + $0x130] sm:$0xff]  ;;  %v24_v16 = vld [vmem:[%s1854_s0 + $0x38] sm:$0xff]  ;;  %v25_v18 = vld [vmem:[%s1854_s0 + $0x40] sm:$0xff] }
   0x7   :  { %1073 = vmatmul.mubr.msk.f32.vlgmr.msra.gmra.mxu0 %vm83_vm0, %v18_v4  ;;  %1121 = vmatmul.mubr.msk.f32.vlgmr.msra.gmra.mxu1 %vm83_vm0, %v50_v5  ;;  %v56_v17 = vld [vmem:[%s1854_s0 + $0x138] sm:$0xff]  ;;  %v57_v19 = vld [vmem:[%s1854_s0 + $0x140] sm:$0xff]  ;;  %v26_v20 = vld [vmem:[%s1854_s0 + $0x48] sm:$0xff] }
   0x8   :  { %1075 = vmatprep.mubr.msk.f32.mxu0 %vm83_vm0, %v19_v6  ;;  %1123 = vmatprep.mubr.msk.f32.mxu1 %vm83_vm0, %v51_v7  ;;  %v58_v21 = vld [vmem:[%s1854_s0 + $0x148] sm:$0xff]  ;;  %v27_v22 = vld [vmem:[%s1854_s0 + $0x50] sm:$0xff]  ;;  %v28_v24 = vld [vmem:[%s1854_s0 + $0x58] sm:$0xff] }
   0x9   :  { %v59_v23 = vld [vmem:[%s1854_s0 + $0x150] sm:$0xff]  ;;  %v60_v25 = vld [vmem:[%s1854_s0 + $0x158] sm:$0xff]  ;;  %v29_v26 = vld [vmem:[%s1854_s0 + $0x60] sm:$0xff] }
   0xa   :  { %v61_v27 = vld [vmem:[%s1854_s0 + $0x160] sm:$0xff]  ;;  %v30_v28 = vld [vmem:[%s1854_s0 + $0x68] sm:$0xff]  ;;  %v31_v30 = vld [vmem:[%s1854_s0 + $0x70] sm:$0xff] }
   0xb   :  { %1076 = vmatmul.mubr.msk.f32.gmra.mxu0 %vm83_vm0, %v20_v8  ;;  %1124 = vmatmul.mubr.msk.f32.gmra.mxu1 %vm83_vm0, %v52_v9  ;;  %v62_v29 = vld [vmem:[%s1854_s0 + $0x168] sm:$0xff]  ;;  %v63_v31 = vld [vmem:[%s1854_s0 + $0x170] sm:$0xff]  ;;  %v32_v32 = vld [vmem:[%s1854_s0 + $0x78] sm:$0xff] }
   0xc   :  { %1078 = vmatprep.mubr.msk.f32.mxu0 %vm83_vm0, %v21_v10  ;;  %1126 = vmatprep.mubr.msk.f32.mxu1 %vm83_vm0, %v53_v11  ;;  %v64_v33 = vld [vmem:[%s1854_s0 + $0x178] sm:$0xff]  ;;  %v33_v34 = vld [vmem:[%s1854_s0 + $0x80] sm:$0xff]  ;;  %v34_v36 = vld [vmem:[%s1854_s0 + $0x88] sm:$0xff] }
   0xd   :  { %v65_v35 = vld [vmem:[%s1854_s0 + $0x180] sm:$0xff]  ;;  %v66_v37 = vld [vmem:[%s1854_s0 + $0x188] sm:$0xff]  ;;  %v35_v38 = vld [vmem:[%s1854_s0 + $0x90] sm:$0xff] }
   0xe   :  { %v67_v39 = vld [vmem:[%s1854_s0 + $0x190] sm:$0xff]  ;;  %v36_v40 = vld [vmem:[%s1854_s0 + $0x98] sm:$0xff]  ;;  %v37_v42 = vld [vmem:[%s1854_s0 + $0xa0] sm:$0xff] }
   0xf   :  { %1079 = vmatmul.mubr.msk.f32.gmra.mxu0 %vm83_vm0, %v22_v12  ;;  %1127 = vmatmul.mubr.msk.f32.gmra.mxu1 %vm83_vm0, %v54_v13  ;;  %v68_v41 = vld [vmem:[%s1854_s0 + $0x198] sm:$0xff]  ;;  %v69_v43 = vld [vmem:[%s1854_s0 + $0x1a0] sm:$0xff]  ;;  %v38_v44 = vld [vmem:[%s1854_s0 + $0xa8] sm:$0xff] }
  0x10   :  { %1081 = vmatprep.mubr.msk.f32.mxu0 %vm83_vm0, %v23_v14  ;;  %1129 = vmatprep.mubr.msk.f32.mxu1 %vm83_vm0, %v55_v15  ;;  %v70_v45 = vld [vmem:[%s1854_s0 + $0x1a8] sm:$0xff]  ;;  %v39_v46 = vld [vmem:[%s1854_s0 + $0xb0] sm:$0xff]  ;;  %v40_v48 = vld [vmem:[%s1854_s0 + $0xb8] sm:$0xff] }
  0x11   :  { %v71_v47 = vld [vmem:[%s1854_s0 + $0x1b0] sm:$0xff]  ;;  %v72_v49 = vld [vmem:[%s1854_s0 + $0x1b8] sm:$0xff]  ;;  %v41_v50 = vld [vmem:[%s1854_s0 + $0xc0] sm:$0xff] }
  0x12   :  { %v73_v51 = vld [vmem:[%s1854_s0 + $0x1c0] sm:$0xff]  ;;  %v42_v52 = vld [vmem:[%s1854_s0 + $0xc8] sm:$0xff]  ;;  %v43_v54 = vld [vmem:[%s1854_s0 + $0xd0] sm:$0xff] }
  0x13   :  { %1082 = vmatmul.mubr.msk.f32.gmra.mxu0 %vm83_vm0, %v24_v16  ;;  %1130 = vmatmul.mubr.msk.f32.gmra.mxu1 %vm83_vm0, %v56_v17  ;;  %v74_v53 = vld [vmem:[%s1854_s0 + $0x1c8] sm:$0xff]  ;;  %v75_v55 = vld [vmem:[%s1854_s0 + $0x1d0] sm:$0xff]  ;;  %v44_v56 = vld [vmem:[%s1854_s0 + $0xd8] sm:$0xff] }
  0x14   :  { %1084 = vmatprep.mubr.msk.f32.mxu0 %vm83_vm0, %v25_v18  ;;  %1132 = vmatprep.mubr.msk.f32.mxu1 %vm83_vm0, %v57_v19  ;;  %v76_v57 = vld [vmem:[%s1854_s0 + $0x1d8] sm:$0xff]  ;;  %v45_v58 = vld [vmem:[%s1854_s0 + $0xe0] sm:$0xff]  ;;  %v46_v60 = vld [vmem:[%s1854_s0 + $0xe8] sm:$0xff] }
  0x15   :  { %v77_v59 = vld [vmem:[%s1854_s0 + $0x1e0] sm:$0xff]  ;;  %v78_v61 = vld [vmem:[%s1854_s0 + $0x1e8] sm:$0xff]  ;;  %v47_v62 = vld [vmem:[%s1854_s0 + $0xf0] sm:$0xff] }
  0x16   :  { %v79_v63 = vld [vmem:[%s1854_s0 + $0x1f0] sm:$0xff]  ;;  %v48_v0 = vld [vmem:[%s1854_s0 + $0xf8] sm:$0xff]  ;;  %v1462_v2 = vld [vmem:[%s1855_s2] ss:$0 sm:$0xff] }
  0x17   :  { %1085 = vmatmul.mubr.msk.f32.gmra.mxu0 %vm83_vm0, %v26_v20  ;;  %1133 = vmatmul.mubr.msk.f32.gmra.mxu1 %vm83_vm0, %v58_v21  ;;  %v80_v1 = vld [vmem:[%s1854_s0 + $0x1f8] sm:$0xff]  ;;  %v1467_v4 = vld [vmem:[%s1856_s3] ss:$0 sm:$0xff] }
  0x18   :  { %1087 = vmatprep.mubr.msk.f32.mxu0 %vm83_vm0, %v27_v22  ;;  %1135 = vmatprep.mubr.msk.f32.mxu1 %vm83_vm0, %v59_v23 }
  0x1b   :  { %1088 = vmatmul.mubr.msk.f32.gmra.mxu0 %vm83_vm0, %v28_v24  ;;  %1136 = vmatmul.mubr.msk.f32.gmra.mxu1 %vm83_vm0, %v60_v25 }
  0x1c   :  { %1090 = vmatprep.mubr.msk.f32.mxu0 %vm83_vm0, %v29_v26  ;;  %1138 = vmatprep.mubr.msk.f32.mxu1 %vm83_vm0, %v61_v27 }
  0x1f   :  { %1091 = vmatmul.mubr.msk.f32.gmra.mxu0 %vm83_vm0, %v30_v28  ;;  %1139 = vmatmul.mubr.msk.f32.gmra.mxu1 %vm83_vm0, %v62_v29 }
  0x20   :  { %1093 = vmatprep.mubr.msk.f32.mxu0 %vm83_vm0, %v31_v30  ;;  %1141 = vmatprep.mubr.msk.f32.mxu1 %vm83_vm0, %v63_v31 }
  0x23   :  { %1094 = vmatmul.mubr.msk.f32.gmra.mxu0 %vm83_vm0, %v32_v32  ;;  %1142 = vmatmul.mubr.msk.f32.gmra.mxu1 %vm83_vm0, %v64_v33 }
  0x24   :  { %1096 = vmatprep.mubr.msk.f32.mxu0 %vm83_vm0, %v33_v34  ;;  %1144 = vmatprep.mubr.msk.f32.mxu1 %vm83_vm0, %v65_v35 }
  0x27   :  { %1097 = vmatmul.mubr.msk.f32.gmra.mxu0 %vm83_vm0, %v34_v36  ;;  %1145 = vmatmul.mubr.msk.f32.gmra.mxu1 %vm83_vm0, %v66_v37 }
  0x28   :  { %1099 = vmatprep.mubr.msk.f32.mxu0 %vm83_vm0, %v35_v38  ;;  %1147 = vmatprep.mubr.msk.f32.mxu1 %vm83_vm0, %v67_v39 }
  0x2b   :  { %1100 = vmatmul.mubr.msk.f32.gmra.mxu0 %vm83_vm0, %v36_v40  ;;  %1148 = vmatmul.mubr.msk.f32.gmra.mxu1 %vm83_vm0, %v68_v41 }
  0x2c   :  { %1102 = vmatprep.mubr.msk.f32.mxu0 %vm83_vm0, %v37_v42  ;;  %1150 = vmatprep.mubr.msk.f32.mxu1 %vm83_vm0, %v69_v43 }
  0x2f   :  { %1103 = vmatmul.mubr.msk.f32.gmra.mxu0 %vm83_vm0, %v38_v44  ;;  %1151 = vmatmul.mubr.msk.f32.gmra.mxu1 %vm83_vm0, %v70_v45 }
  0x30   :  { %1105 = vmatprep.mubr.msk.f32.mxu0 %vm83_vm0, %v39_v46  ;;  %1153 = vmatprep.mubr.msk.f32.mxu1 %vm83_vm0, %v71_v47 }
  0x33   :  { %1106 = vmatmul.mubr.msk.f32.gmra.mxu0 %vm83_vm0, %v40_v48  ;;  %1154 = vmatmul.mubr.msk.f32.gmra.mxu1 %vm83_vm0, %v72_v49 }
  0x34   :  { %1108 = vmatprep.mubr.msk.f32.mxu0 %vm83_vm0, %v41_v50  ;;  %1156 = vmatprep.mubr.msk.f32.mxu1 %vm83_vm0, %v73_v51 }
  0x37   :  { %1109 = vmatmul.mubr.msk.f32.gmra.mxu0 %vm83_vm0, %v42_v52  ;;  %1157 = vmatmul.mubr.msk.f32.gmra.mxu1 %vm83_vm0, %v74_v53 }
  0x38   :  { %1111 = vmatprep.mubr.msk.f32.mxu0 %vm83_vm0, %v43_v54  ;;  %1159 = vmatprep.mubr.msk.f32.mxu1 %vm83_vm0, %v75_v55 }
  0x3b   :  { %1112 = vmatmul.mubr.msk.f32.gmra.mxu0 %vm83_vm0, %v44_v56  ;;  %1160 = vmatmul.mubr.msk.f32.gmra.mxu1 %vm83_vm0, %v76_v57 }
  0x3c   :  { %1114 = vmatprep.mubr.msk.f32.mxu0 %vm83_vm0, %v45_v58  ;;  %1162 = vmatprep.mubr.msk.f32.mxu1 %vm83_vm0, %v77_v59 }
  0x3f   :  { %1115 = vmatmul.mubr.msk.f32.gmra.mxu0 %vm83_vm0, %v46_v60  ;;  %1163 = vmatmul.mubr.msk.f32.gmra.mxu1 %vm83_vm0, %v78_v61 }
  0x40   :  { %1117 = vmatprep.mubr.msk.f32.mxu0 %vm83_vm0, %v47_v62  ;;  %1165 = vmatprep.mubr.msk.f32.mxu1 %vm83_vm0, %v79_v63 }
  0x43   :  { %1118 = vmatmul.mubr.msk.f32.gmra.mxu0 %vm83_vm0, %v48_v0  ;;  %1166 = vmatmul.mubr.msk.f32.gmra.mxu1 %vm83_vm0, %v80_v1 }
  0xc7   :  { %v1074_v3 = vpop.f32.mrf.mxu0  ;;  %v1122_v5 = vpop.f32.mrf.mxu1 }
  0xc8   :  { %v669_v6 = vmul.f32 %v1074_v3, %v1462_v2  ;;  %v701_v7 = vmul.f32 %v1122_v5, %v1462_v2 }
  0xc9   :  { %v342_v8 = vpop.f32.mrf.mxu0  ;;  %v502_v9 = vpop.f32.mrf.mxu1 }
  0xca   :  { %v740_v10 = vadd.f32 %v1467_v4, %v669_v6  ;;  %v772_v11 = vadd.f32 %v1467_v4, %v701_v7  ;;  %v668_v12 = vmul.f32 %v1462_v2, %v342_v8  ;;  %v700_v13 = vmul.f32 %v1462_v2, %v502_v9 }
  0xcb   :  { %v1077_v14 = vpop.f32.mrf.mxu0  ;;  %v1125_v15 = vpop.f32.mrf.mxu1 }
  0xcc   :  { %v804_v16 = vmax.f32 %v740_v10, 0.0  ;;  %v836_v17 = vmax.f32 %v772_v11, 0.0  ;;  %v739_v18 = vadd.f32 %v1467_v4, %v668_v12  ;;  %v771_v19 = vadd.f32 %v1467_v4, %v700_v13 }
  0xcd   :  { %v671_v20 = vmul.f32 %v1077_v14, %v1462_v2  ;;  %v703_v21 = vmul.f32 %v1125_v15, %v1462_v2  ;;  %v352_v22 = vpop.f32.mrf.mxu0  ;;  %v512_v23 = vpop.f32.mrf.mxu1 }
  0xce   :  { %869 = vst.msk [vmem:[%s1857_s4 + $0x8] sm:$0xff] %vm867_vm1, %v804_v16  ;;  %901 = vst.msk [vmem:[%s1857_s4 + $0x108] sm:$0xff] %vm867_vm1, %v836_v17  ;;  %v803_v24 = vmax.f32 %v739_v18, 0.0  ;;  %v835_v25 = vmax.f32 %v771_v19, 0.0  ;;  %v670_v26 = vmul.f32 %v1462_v2, %v352_v22  ;;  %v702_v27 = vmul.f32 %v1462_v2, %v512_v23 }
  0xcf   :  { %v742_v28 = vadd.f32 %v1467_v4, %v671_v20  ;;  %v774_v29 = vadd.f32 %v1467_v4, %v703_v21  ;;  %v1080_v30 = vpop.f32.mrf.mxu0  ;;  %v1128_v31 = vpop.f32.mrf.mxu1 }
  0xd0   :  { %868 = vst.msk [vmem:[%s1857_s4] sm:$0xff] %vm867_vm1, %v803_v24  ;;  %900 = vst.msk [vmem:[%s1857_s4 + $0x100] sm:$0xff] %vm867_vm1, %v835_v25  ;;  %v741_v32 = vadd.f32 %v1467_v4, %v670_v26  ;;  %v773_v33 = vadd.f32 %v1467_v4, %v702_v27  ;;  %v673_v34 = vmul.f32 %v1080_v30, %v1462_v2 }
  0xd1   :  { %v705_v35 = vmul.f32 %v1128_v31, %v1462_v2  ;;  %v806_v36 = vmax.f32 %v742_v28, 0.0  ;;  %v838_v37 = vmax.f32 %v774_v29, 0.0  ;;  %v362_v38 = vpop.f32.mrf.mxu0  ;;  %v522_v39 = vpop.f32.mrf.mxu1 }
  0xd2   :  { %v805_v40 = vmax.f32 %v741_v32, 0.0  ;;  %v837_v41 = vmax.f32 %v773_v33, 0.0  ;;  %v744_v42 = vadd.f32 %v1467_v4, %v673_v34  ;;  %v672_v44 = vmul.f32 %v1462_v2, %v362_v38 }
  0xd3   :  { %v776_v43 = vadd.f32 %v1467_v4, %v705_v35  ;;  %871 = vst.msk [vmem:[%s1857_s4 + $0x18] sm:$0xff] %vm867_vm1, %v806_v36  ;;  %903 = vst.msk [vmem:[%s1857_s4 + $0x118] sm:$0xff] %vm867_vm1, %v838_v37  ;;  %v704_v45 = vmul.f32 %v1462_v2, %v522_v39  ;;  %v1083_v46 = vpop.f32.mrf.mxu0  ;;  %v1131_v47 = vpop.f32.mrf.mxu1 }
  0xd4   :  { %870 = vst.msk [vmem:[%s1857_s4 + $0x10] sm:$0xff] %vm867_vm1, %v805_v40  ;;  %902 = vst.msk [vmem:[%s1857_s4 + $0x110] sm:$0xff] %vm867_vm1, %v837_v41  ;;  %v808_v48 = vmax.f32 %v744_v42, 0.0  ;;  %v675_v50 = vmul.f32 %v1083_v46, %v1462_v2  ;;  %v707_v51 = vmul.f32 %v1131_v47, %v1462_v2  ;;  %v743_v52 = vadd.f32 %v1467_v4, %v672_v44 }
  0xd5   :  { %v840_v49 = vmax.f32 %v776_v43, 0.0  ;;  %v775_v53 = vadd.f32 %v1467_v4, %v704_v45  ;;  %v372_v54 = vpop.f32.mrf.mxu0  ;;  %v532_v55 = vpop.f32.mrf.mxu1 }
  0xd6   :  { %873 = vst.msk [vmem:[%s1857_s4 + $0x28] sm:$0xff] %vm867_vm1, %v808_v48  ;;  %v746_v56 = vadd.f32 %v1467_v4, %v675_v50  ;;  %v778_v57 = vadd.f32 %v1467_v4, %v707_v51  ;;  %v674_v58 = vmul.f32 %v1462_v2, %v372_v54  ;;  %v706_v59 = vmul.f32 %v1462_v2, %v532_v55 }
  0xd7   :  { %905 = vst.msk [vmem:[%s1857_s4 + $0x128] sm:$0xff] %vm867_vm1, %v840_v49  ;;  %v807_v60 = vmax.f32 %v743_v52, 0.0  ;;  %v839_v61 = vmax.f32 %v775_v53, 0.0  ;;  %v1086_v62 = vpop.f32.mrf.mxu0  ;;  %v1134_v63 = vpop.f32.mrf.mxu1 }
  0xd8   :  { %v810_v0 = vmax.f32 %v746_v56, 0.0  ;;  %v842_v1 = vmax.f32 %v778_v57, 0.0  ;;  %v745_v3 = vadd.f32 %v1467_v4, %v674_v58  ;;  %v777_v5 = vadd.f32 %v1467_v4, %v706_v59 }
  0xd9   :  { %872 = vst.msk [vmem:[%s1857_s4 + $0x20] sm:$0xff] %vm867_vm1, %v807_v60  ;;  %904 = vst.msk [vmem:[%s1857_s4 + $0x120] sm:$0xff] %vm867_vm1, %v839_v61  ;;  %v677_v6 = vmul.f32 %v1086_v62, %v1462_v2  ;;  %v709_v7 = vmul.f32 %v1134_v63, %v1462_v2  ;;  %v382_v8 = vpop.f32.mrf.mxu0  ;;  %v542_v9 = vpop.f32.mrf.mxu1 }
  0xda   :  { %875 = vst.msk [vmem:[%s1857_s4 + $0x38] sm:$0xff] %vm867_vm1, %v810_v0  ;;  %907 = vst.msk [vmem:[%s1857_s4 + $0x138] sm:$0xff] %vm867_vm1, %v842_v1  ;;  %v809_v10 = vmax.f32 %v745_v3, 0.0  ;;  %v841_v11 = vmax.f32 %v777_v5, 0.0  ;;  %v676_v12 = vmul.f32 %v1462_v2, %v382_v8  ;;  %v708_v13 = vmul.f32 %v1462_v2, %v542_v9 }
  0xdb   :  { %v748_v14 = vadd.f32 %v1467_v4, %v677_v6  ;;  %v780_v15 = vadd.f32 %v1467_v4, %v709_v7  ;;  %v1089_v16 = vpop.f32.mrf.mxu0  ;;  %v1137_v17 = vpop.f32.mrf.mxu1 }
  0xdc   :  { %874 = vst.msk [vmem:[%s1857_s4 + $0x30] sm:$0xff] %vm867_vm1, %v809_v10  ;;  %906 = vst.msk [vmem:[%s1857_s4 + $0x130] sm:$0xff] %vm867_vm1, %v841_v11  ;;  %v747_v18 = vadd.f32 %v1467_v4, %v676_v12  ;;  %v779_v19 = vadd.f32 %v1467_v4, %v708_v13  ;;  %v679_v20 = vmul.f32 %v1089_v16, %v1462_v2 }
  0xdd   :  { %v711_v21 = vmul.f32 %v1137_v17, %v1462_v2  ;;  %v812_v22 = vmax.f32 %v748_v14, 0.0  ;;  %v844_v23 = vmax.f32 %v780_v15, 0.0  ;;  %v392_v24 = vpop.f32.mrf.mxu0  ;;  %v552_v25 = vpop.f32.mrf.mxu1 }
  0xde   :  { %v811_v26 = vmax.f32 %v747_v18, 0.0  ;;  %v843_v27 = vmax.f32 %v779_v19, 0.0  ;;  %v750_v28 = vadd.f32 %v1467_v4, %v679_v20  ;;  %v678_v30 = vmul.f32 %v1462_v2, %v392_v24 }
  0xdf   :  { %v782_v29 = vadd.f32 %v1467_v4, %v711_v21  ;;  %877 = vst.msk [vmem:[%s1857_s4 + $0x48] sm:$0xff] %vm867_vm1, %v812_v22  ;;  %909 = vst.msk [vmem:[%s1857_s4 + $0x148] sm:$0xff] %vm867_vm1, %v844_v23  ;;  %v710_v31 = vmul.f32 %v1462_v2, %v552_v25  ;;  %v1092_v32 = vpop.f32.mrf.mxu0  ;;  %v1140_v33 = vpop.f32.mrf.mxu1 }
  0xe0   :  { %876 = vst.msk [vmem:[%s1857_s4 + $0x40] sm:$0xff] %vm867_vm1, %v811_v26  ;;  %908 = vst.msk [vmem:[%s1857_s4 + $0x140] sm:$0xff] %vm867_vm1, %v843_v27  ;;  %v814_v34 = vmax.f32 %v750_v28, 0.0  ;;  %v681_v36 = vmul.f32 %v1092_v32, %v1462_v2  ;;  %v713_v37 = vmul.f32 %v1140_v33, %v1462_v2  ;;  %v749_v38 = vadd.f32 %v1467_v4, %v678_v30 }
  0xe1   :  { %v846_v35 = vmax.f32 %v782_v29, 0.0  ;;  %v781_v39 = vadd.f32 %v1467_v4, %v710_v31  ;;  %v402_v40 = vpop.f32.mrf.mxu0  ;;  %v562_v41 = vpop.f32.mrf.mxu1 }
  0xe2   :  { %879 = vst.msk [vmem:[%s1857_s4 + $0x58] sm:$0xff] %vm867_vm1, %v814_v34  ;;  %v752_v42 = vadd.f32 %v1467_v4, %v681_v36  ;;  %v784_v43 = vadd.f32 %v1467_v4, %v713_v37  ;;  %v680_v44 = vmul.f32 %v1462_v2, %v402_v40  ;;  %v712_v45 = vmul.f32 %v1462_v2, %v562_v41 }
  0xe3   :  { %911 = vst.msk [vmem:[%s1857_s4 + $0x158] sm:$0xff] %vm867_vm1, %v846_v35  ;;  %v813_v46 = vmax.f32 %v749_v38, 0.0  ;;  %v845_v47 = vmax.f32 %v781_v39, 0.0  ;;  %v1095_v48 = vpop.f32.mrf.mxu0  ;;  %v1143_v49 = vpop.f32.mrf.mxu1 }
  0xe4   :  { %v816_v50 = vmax.f32 %v752_v42, 0.0  ;;  %v848_v51 = vmax.f32 %v784_v43, 0.0  ;;  %v751_v52 = vadd.f32 %v1467_v4, %v680_v44  ;;  %v783_v53 = vadd.f32 %v1467_v4, %v712_v45 }
  0xe5   :  { %878 = vst.msk [vmem:[%s1857_s4 + $0x50] sm:$0xff] %vm867_vm1, %v813_v46  ;;  %910 = vst.msk [vmem:[%s1857_s4 + $0x150] sm:$0xff] %vm867_vm1, %v845_v47  ;;  %v683_v54 = vmul.f32 %v1095_v48, %v1462_v2  ;;  %v715_v55 = vmul.f32 %v1143_v49, %v1462_v2  ;;  %v412_v56 = vpop.f32.mrf.mxu0  ;;  %v572_v57 = vpop.f32.mrf.mxu1 }
  0xe6   :  { %881 = vst.msk [vmem:[%s1857_s4 + $0x68] sm:$0xff] %vm867_vm1, %v816_v50  ;;  %913 = vst.msk [vmem:[%s1857_s4 + $0x168] sm:$0xff] %vm867_vm1, %v848_v51  ;;  %v815_v58 = vmax.f32 %v751_v52, 0.0  ;;  %v847_v59 = vmax.f32 %v783_v53, 0.0  ;;  %v682_v60 = vmul.f32 %v1462_v2, %v412_v56  ;;  %v714_v61 = vmul.f32 %v1462_v2, %v572_v57 }
  0xe7   :  { %v754_v62 = vadd.f32 %v1467_v4, %v683_v54  ;;  %v786_v63 = vadd.f32 %v1467_v4, %v715_v55  ;;  %v1098_v0 = vpop.f32.mrf.mxu0  ;;  %v1146_v1 = vpop.f32.mrf.mxu1 }
  0xe8   :  { %880 = vst.msk [vmem:[%s1857_s4 + $0x60] sm:$0xff] %vm867_vm1, %v815_v58  ;;  %912 = vst.msk [vmem:[%s1857_s4 + $0x160] sm:$0xff] %vm867_vm1, %v847_v59  ;;  %v753_v3 = vadd.f32 %v1467_v4, %v682_v60  ;;  %v785_v5 = vadd.f32 %v1467_v4, %v714_v61  ;;  %v685_v6 = vmul.f32 %v1098_v0, %v1462_v2 }
  0xe9   :  { %v717_v7 = vmul.f32 %v1146_v1, %v1462_v2  ;;  %v818_v8 = vmax.f32 %v754_v62, 0.0  ;;  %v850_v9 = vmax.f32 %v786_v63, 0.0  ;;  %v422_v10 = vpop.f32.mrf.mxu0  ;;  %v582_v11 = vpop.f32.mrf.mxu1 }
  0xea   :  { %v817_v12 = vmax.f32 %v753_v3, 0.0  ;;  %v849_v13 = vmax.f32 %v785_v5, 0.0  ;;  %v756_v14 = vadd.f32 %v1467_v4, %v685_v6  ;;  %v684_v16 = vmul.f32 %v1462_v2, %v422_v10 }
  0xeb   :  { %v788_v15 = vadd.f32 %v1467_v4, %v717_v7  ;;  %883 = vst.msk [vmem:[%s1857_s4 + $0x78] sm:$0xff] %vm867_vm1, %v818_v8  ;;  %915 = vst.msk [vmem:[%s1857_s4 + $0x178] sm:$0xff] %vm867_vm1, %v850_v9  ;;  %v716_v17 = vmul.f32 %v1462_v2, %v582_v11  ;;  %v1101_v18 = vpop.f32.mrf.mxu0  ;;  %v1149_v19 = vpop.f32.mrf.mxu1 }
  0xec   :  { %882 = vst.msk [vmem:[%s1857_s4 + $0x70] sm:$0xff] %vm867_vm1, %v817_v12  ;;  %914 = vst.msk [vmem:[%s1857_s4 + $0x170] sm:$0xff] %vm867_vm1, %v849_v13  ;;  %v820_v20 = vmax.f32 %v756_v14, 0.0  ;;  %v687_v22 = vmul.f32 %v1101_v18, %v1462_v2  ;;  %v719_v23 = vmul.f32 %v1149_v19, %v1462_v2  ;;  %v755_v24 = vadd.f32 %v1467_v4, %v684_v16 }
  0xed   :  { %v852_v21 = vmax.f32 %v788_v15, 0.0  ;;  %v787_v25 = vadd.f32 %v1467_v4, %v716_v17  ;;  %v432_v26 = vpop.f32.mrf.mxu0  ;;  %v592_v27 = vpop.f32.mrf.mxu1 }
  0xee   :  { %885 = vst.msk [vmem:[%s1857_s4 + $0x88] sm:$0xff] %vm867_vm1, %v820_v20  ;;  %v758_v28 = vadd.f32 %v1467_v4, %v687_v22  ;;  %v790_v29 = vadd.f32 %v1467_v4, %v719_v23  ;;  %v686_v30 = vmul.f32 %v1462_v2, %v432_v26  ;;  %v718_v31 = vmul.f32 %v1462_v2, %v592_v27 }
  0xef   :  { %917 = vst.msk [vmem:[%s1857_s4 + $0x188] sm:$0xff] %vm867_vm1, %v852_v21  ;;  %v819_v32 = vmax.f32 %v755_v24, 0.0  ;;  %v851_v33 = vmax.f32 %v787_v25, 0.0  ;;  %v1104_v34 = vpop.f32.mrf.mxu0  ;;  %v1152_v35 = vpop.f32.mrf.mxu1 }
  0xf0   :  { %v822_v36 = vmax.f32 %v758_v28, 0.0  ;;  %v854_v37 = vmax.f32 %v790_v29, 0.0  ;;  %v757_v38 = vadd.f32 %v1467_v4, %v686_v30  ;;  %v789_v39 = vadd.f32 %v1467_v4, %v718_v31 }
  0xf1   :  { %884 = vst.msk [vmem:[%s1857_s4 + $0x80] sm:$0xff] %vm867_vm1, %v819_v32  ;;  %916 = vst.msk [vmem:[%s1857_s4 + $0x180] sm:$0xff] %vm867_vm1, %v851_v33  ;;  %v689_v40 = vmul.f32 %v1104_v34, %v1462_v2  ;;  %v721_v41 = vmul.f32 %v1152_v35, %v1462_v2  ;;  %v442_v42 = vpop.f32.mrf.mxu0  ;;  %v602_v43 = vpop.f32.mrf.mxu1 }
  0xf2   :  { %887 = vst.msk [vmem:[%s1857_s4 + $0x98] sm:$0xff] %vm867_vm1, %v822_v36  ;;  %919 = vst.msk [vmem:[%s1857_s4 + $0x198] sm:$0xff] %vm867_vm1, %v854_v37  ;;  %v821_v44 = vmax.f32 %v757_v38, 0.0  ;;  %v853_v45 = vmax.f32 %v789_v39, 0.0  ;;  %v688_v46 = vmul.f32 %v1462_v2, %v442_v42  ;;  %v720_v47 = vmul.f32 %v1462_v2, %v602_v43 }
  0xf3   :  { %v760_v48 = vadd.f32 %v1467_v4, %v689_v40  ;;  %v792_v49 = vadd.f32 %v1467_v4, %v721_v41  ;;  %v1107_v50 = vpop.f32.mrf.mxu0  ;;  %v1155_v51 = vpop.f32.mrf.mxu1 }
  0xf4   :  { %886 = vst.msk [vmem:[%s1857_s4 + $0x90] sm:$0xff] %vm867_vm1, %v821_v44  ;;  %918 = vst.msk [vmem:[%s1857_s4 + $0x190] sm:$0xff] %vm867_vm1, %v853_v45  ;;  %v759_v52 = vadd.f32 %v1467_v4, %v688_v46  ;;  %v791_v53 = vadd.f32 %v1467_v4, %v720_v47  ;;  %v691_v54 = vmul.f32 %v1107_v50, %v1462_v2 }
  0xf5   :  { %v723_v55 = vmul.f32 %v1155_v51, %v1462_v2  ;;  %v824_v56 = vmax.f32 %v760_v48, 0.0  ;;  %v856_v57 = vmax.f32 %v792_v49, 0.0  ;;  %v452_v58 = vpop.f32.mrf.mxu0  ;;  %v612_v59 = vpop.f32.mrf.mxu1 }
  0xf6   :  { %v823_v60 = vmax.f32 %v759_v52, 0.0  ;;  %v855_v61 = vmax.f32 %v791_v53, 0.0  ;;  %v762_v62 = vadd.f32 %v1467_v4, %v691_v54  ;;  %v690_v0 = vmul.f32 %v1462_v2, %v452_v58 }
  0xf7   :  { %v794_v63 = vadd.f32 %v1467_v4, %v723_v55  ;;  %889 = vst.msk [vmem:[%s1857_s4 + $0xa8] sm:$0xff] %vm867_vm1, %v824_v56  ;;  %921 = vst.msk [vmem:[%s1857_s4 + $0x1a8] sm:$0xff] %vm867_vm1, %v856_v57  ;;  %v722_v1 = vmul.f32 %v1462_v2, %v612_v59  ;;  %v1110_v3 = vpop.f32.mrf.mxu0  ;;  %v1158_v5 = vpop.f32.mrf.mxu1 }
  0xf8   :  { %888 = vst.msk [vmem:[%s1857_s4 + $0xa0] sm:$0xff] %vm867_vm1, %v823_v60  ;;  %920 = vst.msk [vmem:[%s1857_s4 + $0x1a0] sm:$0xff] %vm867_vm1, %v855_v61  ;;  %v826_v6 = vmax.f32 %v762_v62, 0.0  ;;  %v693_v8 = vmul.f32 %v1110_v3, %v1462_v2  ;;  %v725_v9 = vmul.f32 %v1158_v5, %v1462_v2  ;;  %v761_v10 = vadd.f32 %v1467_v4, %v690_v0 }
  0xf9   :  { %v858_v7 = vmax.f32 %v794_v63, 0.0  ;;  %v793_v11 = vadd.f32 %v1467_v4, %v722_v1  ;;  %v462_v12 = vpop.f32.mrf.mxu0  ;;  %v622_v13 = vpop.f32.mrf.mxu1 }
  0xfa   :  { %891 = vst.msk [vmem:[%s1857_s4 + $0xb8] sm:$0xff] %vm867_vm1, %v826_v6  ;;  %v764_v14 = vadd.f32 %v1467_v4, %v693_v8  ;;  %v796_v15 = vadd.f32 %v1467_v4, %v725_v9  ;;  %v692_v16 = vmul.f32 %v1462_v2, %v462_v12  ;;  %v724_v17 = vmul.f32 %v1462_v2, %v622_v13 }
  0xfb   :  { %923 = vst.msk [vmem:[%s1857_s4 + $0x1b8] sm:$0xff] %vm867_vm1, %v858_v7  ;;  %v825_v18 = vmax.f32 %v761_v10, 0.0  ;;  %v857_v19 = vmax.f32 %v793_v11, 0.0  ;;  %v1113_v20 = vpop.f32.mrf.mxu0  ;;  %v1161_v21 = vpop.f32.mrf.mxu1 }
  0xfc   :  { %v828_v22 = vmax.f32 %v764_v14, 0.0  ;;  %v860_v23 = vmax.f32 %v796_v15, 0.0  ;;  %v763_v24 = vadd.f32 %v1467_v4, %v692_v16  ;;  %v795_v25 = vadd.f32 %v1467_v4, %v724_v17 }
  0xfd   :  { %890 = vst.msk [vmem:[%s1857_s4 + $0xb0] sm:$0xff] %vm867_vm1, %v825_v18  ;;  %922 = vst.msk [vmem:[%s1857_s4 + $0x1b0] sm:$0xff] %vm867_vm1, %v857_v19  ;;  %v695_v26 = vmul.f32 %v1113_v20, %v1462_v2  ;;  %v727_v27 = vmul.f32 %v1161_v21, %v1462_v2  ;;  %v472_v28 = vpop.f32.mrf.mxu0  ;;  %v632_v29 = vpop.f32.mrf.mxu1 }
  0xfe   :  { %893 = vst.msk [vmem:[%s1857_s4 + $0xc8] sm:$0xff] %vm867_vm1, %v828_v22  ;;  %925 = vst.msk [vmem:[%s1857_s4 + $0x1c8] sm:$0xff] %vm867_vm1, %v860_v23  ;;  %v827_v30 = vmax.f32 %v763_v24, 0.0  ;;  %v859_v31 = vmax.f32 %v795_v25, 0.0  ;;  %v694_v32 = vmul.f32 %v1462_v2, %v472_v28  ;;  %v726_v33 = vmul.f32 %v1462_v2, %v632_v29 }
  0xff   :  { %v766_v34 = vadd.f32 %v1467_v4, %v695_v26  ;;  %v798_v35 = vadd.f32 %v1467_v4, %v727_v27  ;;  %v1116_v36 = vpop.f32.mrf.mxu0  ;;  %v1164_v37 = vpop.f32.mrf.mxu1 }
 0x100   :  { %892 = vst.msk [vmem:[%s1857_s4 + $0xc0] sm:$0xff] %vm867_vm1, %v827_v30  ;;  %924 = vst.msk [vmem:[%s1857_s4 + $0x1c0] sm:$0xff] %vm867_vm1, %v859_v31  ;;  %v765_v38 = vadd.f32 %v1467_v4, %v694_v32  ;;  %v797_v39 = vadd.f32 %v1467_v4, %v726_v33  ;;  %v697_v40 = vmul.f32 %v1116_v36, %v1462_v2 }
 0x101   :  { %v729_v41 = vmul.f32 %v1164_v37, %v1462_v2  ;;  %v830_v42 = vmax.f32 %v766_v34, 0.0  ;;  %v862_v43 = vmax.f32 %v798_v35, 0.0  ;;  %v482_v44 = vpop.f32.mrf.mxu0  ;;  %v642_v45 = vpop.f32.mrf.mxu1 }
 0x102   :  { %v829_v46 = vmax.f32 %v765_v38, 0.0  ;;  %v861_v47 = vmax.f32 %v797_v39, 0.0  ;;  %v768_v48 = vadd.f32 %v1467_v4, %v697_v40  ;;  %v696_v50 = vmul.f32 %v1462_v2, %v482_v44 }
 0x103   :  { %v800_v49 = vadd.f32 %v1467_v4, %v729_v41  ;;  %895 = vst.msk [vmem:[%s1857_s4 + $0xd8] sm:$0xff] %vm867_vm1, %v830_v42  ;;  %927 = vst.msk [vmem:[%s1857_s4 + $0x1d8] sm:$0xff] %vm867_vm1, %v862_v43  ;;  %v728_v51 = vmul.f32 %v1462_v2, %v642_v45  ;;  %v1119_v52 = vpop.f32.mrf.mxu0  ;;  %v1167_v53 = vpop.f32.mrf.mxu1 }
 0x104   :  { %894 = vst.msk [vmem:[%s1857_s4 + $0xd0] sm:$0xff] %vm867_vm1, %v829_v46  ;;  %926 = vst.msk [vmem:[%s1857_s4 + $0x1d0] sm:$0xff] %vm867_vm1, %v861_v47  ;;  %v832_v54 = vmax.f32 %v768_v48, 0.0  ;;  %v699_v56 = vmul.f32 %v1119_v52, %v1462_v2  ;;  %v731_v57 = vmul.f32 %v1167_v53, %v1462_v2  ;;  %v767_v58 = vadd.f32 %v1467_v4, %v696_v50 }
 0x105   :  { %v864_v55 = vmax.f32 %v800_v49, 0.0  ;;  %v799_v59 = vadd.f32 %v1467_v4, %v728_v51  ;;  %v492_v60 = vpop.f32.mrf.mxu0  ;;  %v652_v61 = vpop.f32.mrf.mxu1 }
 0x106   :  { %897 = vst.msk [vmem:[%s1857_s4 + $0xe8] sm:$0xff] %vm867_vm1, %v832_v54  ;;  %v770_v62 = vadd.f32 %v1467_v4, %v699_v56  ;;  %v802_v63 = vadd.f32 %v1467_v4, %v731_v57  ;;  %v698_v0 = vmul.f32 %v1462_v2, %v492_v60  ;;  %v730_v1 = vmul.f32 %v1462_v2, %v652_v61 }
 0x107   :  { %929 = vst.msk [vmem:[%s1857_s4 + $0x1e8] sm:$0xff] %vm867_vm1, %v864_v55  ;;  %v831_v3 = vmax.f32 %v767_v58, 0.0  ;;  %v863_v5 = vmax.f32 %v799_v59, 0.0 }
 0x108   :  { %v834_v6 = vmax.f32 %v770_v62, 0.0  ;;  %v866_v7 = vmax.f32 %v802_v63, 0.0  ;;  %v769_v8 = vadd.f32 %v1467_v4, %v698_v0  ;;  %v801_v9 = vadd.f32 %v1467_v4, %v730_v1 }
 0x109   :  { %896 = vst.msk [vmem:[%s1857_s4 + $0xe0] sm:$0xff] %vm867_vm1, %v831_v3  ;;  %928 = vst.msk [vmem:[%s1857_s4 + $0x1e0] sm:$0xff] %vm867_vm1, %v863_v5 }
 0x10a   :  { %899 = vst.msk [vmem:[%s1857_s4 + $0xf8] sm:$0xff] %vm867_vm1, %v834_v6  ;;  %931 = vst.msk [vmem:[%s1857_s4 + $0x1f8] sm:$0xff] %vm867_vm1, %v866_v7  ;;  %v833_v2 = vmax.f32 %v769_v8, 0.0  ;;  %v865_v4 = vmax.f32 %v801_v9, 0.0 }
 0x10c   :  { %898 = vst.msk [vmem:[%s1857_s4 + $0xf0] sm:$0xff] %vm867_vm1, %v833_v2  ;;  %930 = vst.msk [vmem:[%s1857_s4 + $0x1f0] sm:$0xff] %vm867_vm1, %v865_v4 }

</bundles_post_ra>
